<compile_context>
chip_gen: v6e
topology: v6e:2x2x1
jax: 0.10.0
libtpu: 0.0.40
codegen_flags: <defaults>
</compile_context>

<pallas_src>
import functools
import math

import jax
import jax.numpy as jnp
from jax import lax
from jax.experimental import pallas as pl
from jax.experimental.pallas import tpu as pltpu


_LANE = 128
_SUBLANE = 8
# channels_last inputs with C <= this (and 128 % C == 0) use the lane-packed
# kernel (dense 128-lane rows).
_PACK_MAX_C = 64
_PACK_W = 128
# Minimum grid steps we try to provide along "parallel" axes (feeds both v7x
# TensorCores with some slack).
_MIN_PAR_STEPS = 4
# Hard cap on the per-step (in + out) traffic budget.
_MAX_TARGET_BLOCK_BYTES = 16 * 1024 * 1024


# ---------------------------------------------------------------------------
# sizing helpers
# ---------------------------------------------------------------------------

def _round_up(v, m):
    return ((v + m - 1) // m) * m


@functools.lru_cache(maxsize=None)
def _vmem_budget():
    """(vmem_limit_bytes, per-step (in+out) block byte target), per chip gen."""
    try:
        cap = int(pltpu.get_tpu_info().vmem_capacity_bytes)
    except Exception:
        cap = 64 * 1024 * 1024  # v7x-safe fallback
    vmem_limit = min(int(cap * 3 // 4), 96 * 1024 * 1024)
    # Double-buffered blocks occupy 2x the target; keep >= 1/3 of the limit
    # free for params / scratch / compiler internals.
    target_block = min(_MAX_TARGET_BLOCK_BYTES, max(1 << 20, vmem_limit // 3))
    return vmem_limit, target_block


def _compiler_params(semantics):
    vmem_limit, _ = _vmem_budget()
    return pltpu.CompilerParams(
        dimension_semantics=semantics,
        vmem_limit_bytes=vmem_limit,
    )


def _sublane_quantum(dtype):
    # Native TPU tiles: f32 (8,128), bf16 (16,128), int8/fp8 (32,128).
    return max(_SUBLANE, 32 // jnp.dtype(dtype).itemsize)


def _cap_for_steps(total, quantum, want_steps):
    """Largest tile yielding >= want_steps grid steps (when total allows)."""
    if want_steps <= 1 or total <= quantum:
        return total
    return min(total, _round_up(-(-total // want_steps), quantum))


def _pick_tile(total, quantum, bytes_per_unit, want_steps=1):
    """Largest tile (multiple of quantum, or the full axis) whose (in + out)
    footprint stays inside the block budget, additionally capped so the grid
    axis gets at least `want_steps` steps when possible."""
    _, target = _vmem_budget()
    budget_units = max(1, target // max(1, bytes_per_unit))
    if budget_units >= total:
        tile = total
    else:
        tile = max(quantum, (budget_units // quantum) * quantum)
    return min(tile, _cap_for_steps(total, quantum, want_steps))


# ---------------------------------------------------------------------------
# kernels
# ---------------------------------------------------------------------------

def _ln_channels_first_kernel(x_ref, w_ref, b_ref, o_ref, *, eps):
    # x_ref: (B_TILE, C, HW_TILE)   w_ref/b_ref: (1, C, 1)
    # Normalize over C (sublanes); H*W stays dense on the 128-lane axis.
    x = x_ref[...].astype(jnp.float32)
    mean = jnp.mean(x, axis=1, keepdims=True)
    xc = x - mean
    var = jnp.mean(xc * xc, axis=1, keepdims=True)          # biased variance
    scale = lax.rsqrt(var + eps) * w_ref[...]                # gamma folded in
    o_ref[...] = (xc * scale + b_ref[...]).astype(o_ref.dtype)


def _ln_last_axis_kernel(x_ref, w_ref, b_ref, o_ref, *, eps):
    # x_ref: (ROW_TILE, C)   w_ref/b_ref: (1, C)
    x = x_ref[...].astype(jnp.float32)
    mean = jnp.mean(x, axis=-1, keepdims=True)
    xc = x - mean
    var = jnp.mean(xc * xc, axis=-1, keepdims=True)
    scale = lax.rsqrt(var + eps) * w_ref[...]                # gamma folded in
    o_ref[...] = (xc * scale + b_ref[...]).astype(o_ref.dtype)


def _ln_packed_kernel(x_ref, avg_ref, w_ref, b_ref, o_ref, *, eps):
    # x_ref: (ROW_TILE, 128); each row packs 128//C independent groups of
    # length C contiguously along lanes.  avg_ref is the (128, 128)
    # block-diagonal averaging matrix, so the matmuls produce the per-group
    # mean / variance already broadcast back to every lane of its group.
    x = x_ref[...].astype(jnp.float32)
    avg = avg_ref[...]
    mean = jnp.dot(x, avg, preferred_element_type=jnp.float32)
    xc = x - mean
    var = jnp.dot(xc * xc, avg, preferred_element_type=jnp.float32)
    scale = lax.rsqrt(var + eps) * w_ref[...]                # gamma folded in
    o_ref[...] = (xc * scale + b_ref[...]).astype(o_ref.dtype)


# ---------------------------------------------------------------------------
# wrappers
# ---------------------------------------------------------------------------

def _layernorm_channels_first(x, weight, bias, eps, tile, out_dtype):
    b, c = x.shape[0], x.shape[1]
    hw = int(math.prod(x.shape[2:]))
    x3 = x.reshape(b, c, hw)                 # free reshape, stays NCHW order
    w3 = weight.reshape(1, c, 1)
    b3 = bias.reshape(1, c, 1)

    out_itemsize = jnp.dtype(out_dtype).itemsize
    in_q = _sublane_quantum(x.dtype)
    out_q = _sublane_quantum(out_dtype)
    bytes_per_lane = (_round_up(c, in_q) * x.dtype.itemsize
                      + _round_up(c, out_q) * out_itemsize)

    if tile is not None:
        hw_tile, b_tile = min(tile, hw), 1
    else:
        # Split H*W first; if a whole sample fits the budget, fatten the block
        # along the batch dim (small-feature-map case) while always leaving
        # enough grid steps for both v7x TensorCores.
        want_hw = max(1, -(-_MIN_PAR_STEPS // max(1, b)))
        hw_tile = _pick_tile(hw, _LANE, bytes_per_lane, want_steps=want_hw)
        b_tile = 1
        if hw_tile == hw:
            _, target = _vmem_budget()
            per_sample = _round_up(hw, _LANE) * bytes_per_lane
            b_budget = max(1, target // max(1, per_sample))
            b_cap = _cap_for_steps(b, 1, _MIN_PAR_STEPS)
            b_tile = max(1, min(b, b_budget, b_cap))

    grid = (pl.cdiv(b, b_tile), pl.cdiv(hw, hw_tile))
    cost = pl.CostEstimate(
        flops=7 * b * c * hw,
        transcendentals=b * hw,
        bytes_accessed=(x.size * x.dtype.itemsize
                        + b * c * hw * out_itemsize + 2 * c * 4),
    )

    out = pl.pallas_call(
        functools.partial(_ln_channels_first_kernel, eps=eps),
        out_shape=jax.ShapeDtypeStruct((b, c, hw), out_dtype),
        grid=grid,
        in_specs=[
            pl.BlockSpec((b_tile, c, hw_tile), lambda i, j: (i, 0, j)),
            pl.BlockSpec((1, c, 1), lambda i, j: (0, 0, 0)),
            pl.BlockSpec((1, c, 1), lambda i, j: (0, 0, 0)),
        ],
        out_specs=pl.BlockSpec((b_tile, c, hw_tile), lambda i, j: (i, 0, j)),
        compiler_params=_compiler_params(("parallel", "parallel")),
        cost_estimate=cost,
    )(x3, w3, b3)
    return out.reshape(x.shape)


def _layernorm_last_packed(x2, weight, bias, eps, tile, out_dtype):
    n, c = x2.shape
    r = _PACK_W // c
    n_pad = _round_up(n, r)
    if n_pad != n:
        # TODO(synk): the ragged tail pad costs one extra copy of x; a split
        # main+tail dispatch would avoid it for very large ragged inputs.
        x2 = jnp.pad(x2, ((0, n_pad - n), (0, 0)))
    xp = x2.reshape(n_pad // r, _PACK_W)     # free reshape (contiguous)
    n_rows = xp.shape[0]

    groups = jnp.arange(_PACK_W, dtype=jnp.int32) // c
    avg = (groups[:, None] == groups[None, :]).astype(jnp.float32) * (1.0 / c)
    wp = jnp.tile(weight, r).reshape(1, _PACK_W)
    bp = jnp.tile(bias, r).reshape(1, _PACK_W)

    out_itemsize = jnp.dtype(out_dtype).itemsize
    bytes_per_row = _PACK_W * (x2.dtype.itemsize + out_itemsize)
    quantum = _sublane_quantum(x2.dtype)
    if tile is not None:
        row_tile = min(tile, n_rows)
    else:
        row_tile = _pick_tile(n_rows, quantum, bytes_per_row,
                              want_steps=_MIN_PAR_STEPS)

    cost = pl.CostEstimate(
        flops=2 * 2 * n_rows * _PACK_W * _PACK_W + 5 * n_rows * _PACK_W,
        transcendentals=n_rows * _PACK_W,
        bytes_accessed=(n_rows * bytes_per_row
                        + _PACK_W * _PACK_W * 4 + 2 * _PACK_W * 4),
    )

    out = pl.pallas_call(
        functools.partial(_ln_packed_kernel, eps=eps),
        out_shape=jax.ShapeDtypeStruct((n_rows, _PACK_W), out_dtype),
        grid=(pl.cdiv(n_rows, row_tile),),
        in_specs=[
            pl.BlockSpec((row_tile, _PACK_W), lambda i: (i, 0)),
            pl.BlockSpec((_PACK_W, _PACK_W), lambda i: (0, 0)),
            pl.BlockSpec((1, _PACK_W), lambda i: (0, 0)),
            pl.BlockSpec((1, _PACK_W), lambda i: (0, 0)),
        ],
        out_specs=pl.BlockSpec((row_tile, _PACK_W), lambda i: (i, 0)),
        compiler_params=_compiler_params(("parallel",)),
        cost_estimate=cost,
    )(xp, avg, wp, bp)

    y = out.reshape(n_pad, c)
    if n_pad != n:
        y = y[:n]
    return y


def _layernorm_last_plain(x2, weight, bias, eps, tile, out_dtype):
    n, c = x2.shape
    w2 = weight.reshape(1, c)
    b2 = bias.reshape(1, c)

    out_itemsize = jnp.dtype(out_dtype).itemsize
    bytes_per_row = _round_up(c, _LANE) * (x2.dtype.itemsize + out_itemsize)
    quantum = _sublane_quantum(x2.dtype)
    if tile is not None:
        row_tile = min(tile, n)
    else:
        row_tile = _pick_tile(n, quantum, bytes_per_row,
                              want_steps=_MIN_PAR_STEPS)

    cost = pl.CostEstimate(
        flops=7 * n * c,
        transcendentals=n,
        bytes_accessed=(n * c * (x2.dtype.itemsize + out_itemsize) + 2 * c * 4),
    )

    out = pl.pallas_call(
        functools.partial(_ln_last_axis_kernel, eps=eps),
        out_shape=jax.ShapeDtypeStruct((n, c), out_dtype),
        grid=(pl.cdiv(n, row_tile),),
        in_specs=[
            pl.BlockSpec((row_tile, c), lambda i: (i, 0)),
            pl.BlockSpec((1, c), lambda i: (0, 0)),
            pl.BlockSpec((1, c), lambda i: (0, 0)),
        ],
        out_specs=pl.BlockSpec((row_tile, c), lambda i: (i, 0)),
        compiler_params=_compiler_params(("parallel",)),
        cost_estimate=cost,
    )(x2, w2, b2)
    return out


def _layernorm_channels_last(x, weight, bias, eps, tile, out_dtype):
    c = x.shape[-1]
    n = x.size // c
    x2 = x.reshape(n, c)
    if c <= _PACK_MAX_C and _PACK_W % c == 0:
        y2 = _layernorm_last_packed(x2, weight, bias, eps, tile, out_dtype)
    else:
        y2 = _layernorm_last_plain(x2, weight, bias, eps, tile, out_dtype)
    return y2.reshape(x.shape)


def layer_norm(x, weight, bias, eps=1e-6, data_format="channels_last", *,
               tile=None, out_dtype=None):
    """Forward pass of the PyTorch LayerNorm module.

    Returns float32 by default (the module calls x.float()); pass
    out_dtype=jnp.bfloat16 to opt into narrow writeback.  `tile` optionally
    overrides the data tile length (H*W lanes for channels_first, rows for
    channels_last) for testing/tuning; when it does not cover the full axis
    it must be a multiple of 128 (channels_first) or 8 (channels_last).
    """
    if data_format not in ("channels_last", "channels_first"):
        raise NotImplementedError
    out_dtype = jnp.dtype(jnp.float32 if out_dtype is None else out_dtype)
    weight = weight.astype(jnp.float32)
    bias = bias.astype(jnp.float32)
    if data_format == "channels_first":
        return _layernorm_channels_first(x, weight, bias, eps, tile, out_dtype)
    return _layernorm_channels_last(x, weight, bias, eps, tile, out_dtype)


# ---------------------------------------------------------------------------
# reference + tests
# ---------------------------------------------------------------------------

def _reference(x, weight, bias, eps, data_format):
    x = x.astype(jnp.float32)
    weight = weight.astype(jnp.float32)
    bias = bias.astype(jnp.float32)
    if data_format == "channels_last":
        u = jnp.mean(x, axis=-1, keepdims=True)
        s = jnp.mean((x - u) ** 2, axis=-1, keepdims=True)
        return (x - u) / jnp.sqrt(s + eps) * weight + bias
    u = jnp.mean(x, axis=1, keepdims=True)
    s = jnp.mean((x - u) ** 2, axis=1, keepdims=True)
    xn = (x - u) / jnp.sqrt(s + eps)
    shape = (1, -1) + (1,) * (x.ndim - 2)
    return weight.reshape(shape) * xn + bias.reshape(shape)


if __name__ == "__main__":
    key = jax.random.PRNGKey(0)
    eps = 1e-6

    # (name, shape, data_format, in_dtype, tile override, out_dtype)
    cases = [
        ("cf_basic",         (2, 4, 16, 16), "channels_first", jnp.float32,  None, None),
        ("cf_ragged_lanes",  (2, 4, 16, 17), "channels_first", jnp.float32,  128,  None),
        ("cf_bf16_input",    (2, 4, 16, 16), "channels_first", jnp.bfloat16, None, None),
        ("cf_small_hw",      (4, 8, 7, 7),   "channels_first", jnp.float32,  None, None),
        ("cl_packed",        (2, 16, 16, 4), "channels_last",  jnp.float32,  None, None),
        ("cl_packed_ragged", (2, 16, 20, 4), "channels_last",  jnp.float32,  8,    None),
        ("cl_packed_pad",    (3, 5, 7, 4),   "channels_last",  jnp.float32,  None, None),
        ("cl_wide_ragged",   (2, 8, 8, 256), "channels_last",  jnp.float32,  48,   None),
        ("cl_bf16_out",      (2, 8, 8, 4),   "channels_last",  jnp.bfloat16, None, jnp.bfloat16),
    ]

    for name, shape, fmt, dtype, tile, out_dtype in cases:
        key, kx, kw, kb = jax.random.split(key, 4)
        c = shape[1] if fmt == "channels_first" else shape[-1]
        x = jax.random.normal(kx, shape, dtype=jnp.float32).astype(dtype)
        weight = jax.random.normal(kw, (c,), dtype=jnp.float32)
        bias = jax.random.normal(kb, (c,), dtype=jnp.float32)

        y = layer_norm(x, weight, bias, eps=eps, data_format=fmt,
                       tile=tile, out_dtype=out_dtype)
        y = jax.block_until_ready(y)
        ref = _reference(x, weight, bias, eps, fmt)

        expect_dtype = jnp.dtype(jnp.float32 if out_dtype is None else out_dtype)
        assert y.shape == x.shape, (name, y.shape, x.shape)
        assert y.dtype == expect_dtype, (name, y.dtype)
        tol = 1e-4 if expect_dtype == jnp.dtype(jnp.float32) else 5e-2
        y32 = y.astype(jnp.float32)
        err = float(jnp.max(jnp.abs(y32 - ref)))
        assert jnp.allclose(y32, ref, atol=tol, rtol=tol), (name, err)

    print("KERNEL_OK")
</pallas_src>

<mosaic_0001>
module attributes {stable_mosaic.version = 11 : i64} {
  func.func @_ln_channels_first_kernel(%arg0: i32, %arg1: i32, %arg2: memref<1x4x128xf32, #tpu.memory_space<vmem>>, %arg3: memref<1x4x1xf32, #tpu.memory_space<vmem>>, %arg4: memref<1x4x1xf32, #tpu.memory_space<vmem>>, %arg5: memref<1x4x128xf32, #tpu.memory_space<vmem>>) attributes {dimension_semantics = [#tpu.dimension_semantics<parallel>, #tpu.dimension_semantics<parallel>], iteration_bounds = array<i64: 2, 2>, scalar_prefetch = 0 : i64, scratch_operands = 0 : i64, tpu.core_type = #tpu.core_type<tc>, window_params = [{transform_indices = @transform_0, window_bounds = array<i64: 1, 4, 128>}, {pipeline_mode = #tpu.pipeline_mode<synchronous>, transform_indices = @transform_1, window_bounds = array<i64: 1, 4, 1>}, {pipeline_mode = #tpu.pipeline_mode<synchronous>, transform_indices = @transform_2, window_bounds = array<i64: 1, 4, 1>}, {transform_indices = @transform_3, window_bounds = array<i64: 1, 4, 128>}]} {
    %c0 = arith.constant 0 : index
    %c0_0 = arith.constant 0 : index
    %c0_1 = arith.constant 0 : index
    %0 = vector.load %arg2[%c0, %c0_0, %c0_1] : memref<1x4x128xf32, #tpu.memory_space<vmem>>, vector<1x4x128xf32>
    %cst = arith.constant dense<0.000000e+00> : vector<1x128xf32>
    %1 = vector.multi_reduction <add>, %0, %cst [1] : vector<1x4x128xf32> to vector<1x128xf32>
    %2 = vector.shape_cast %1 : vector<1x128xf32> to vector<1x1x128xf32>
    %cst_2 = arith.constant 4.000000e+00 : f32
    %3 = vector.broadcast %cst_2 : f32 to vector<1x1x128xf32>
    %4 = arith.divf %2, %3 : vector<1x1x128xf32>
    %5 = vector.broadcast %4 : vector<1x1x128xf32> to vector<1x4x128xf32>
    %6 = arith.subf %0, %5 : vector<1x4x128xf32>
    %7 = arith.mulf %6, %6 : vector<1x4x128xf32>
    %cst_3 = arith.constant dense<0.000000e+00> : vector<1x128xf32>
    %8 = vector.multi_reduction <add>, %7, %cst_3 [1] : vector<1x4x128xf32> to vector<1x128xf32>
    %9 = vector.shape_cast %8 : vector<1x128xf32> to vector<1x1x128xf32>
    %cst_4 = arith.constant 4.000000e+00 : f32
    %10 = vector.broadcast %cst_4 : f32 to vector<1x1x128xf32>
    %11 = arith.divf %9, %10 : vector<1x1x128xf32>
    %cst_5 = arith.constant 9.99999997E-7 : f32
    %12 = vector.broadcast %cst_5 : f32 to vector<1x1x128xf32>
    %13 = arith.addf %11, %12 : vector<1x1x128xf32>
    %14 = math.rsqrt %13 : vector<1x1x128xf32>
    %c0_6 = arith.constant 0 : index
    %c0_7 = arith.constant 0 : index
    %c0_8 = arith.constant 0 : index
    %15 = vector.load %arg3[%c0_6, %c0_7, %c0_8] : memref<1x4x1xf32, #tpu.memory_space<vmem>>, vector<1x4x1xf32>
    %16 = vector.broadcast %14 : vector<1x1x128xf32> to vector<1x4x128xf32>
    %17 = vector.broadcast %15 : vector<1x4x1xf32> to vector<1x4x128xf32>
    %18 = arith.mulf %16, %17 : vector<1x4x128xf32>
    %19 = arith.mulf %6, %18 : vector<1x4x128xf32>
    %c0_9 = arith.constant 0 : index
    %c0_10 = arith.constant 0 : index
    %c0_11 = arith.constant 0 : index
    %20 = vector.load %arg4[%c0_9, %c0_10, %c0_11] : memref<1x4x1xf32, #tpu.memory_space<vmem>>, vector<1x4x1xf32>
    %21 = vector.broadcast %20 : vector<1x4x1xf32> to vector<1x4x128xf32>
    %22 = arith.addf %19, %21 : vector<1x4x128xf32>
    %c0_12 = arith.constant 0 : index
    %c0_13 = arith.constant 0 : index
    %c0_14 = arith.constant 0 : index
    %23 = vector.load %arg5[%c0_12, %c0_13, %c0_14] : memref<1x4x128xf32, #tpu.memory_space<vmem>>, vector<1x4x128xf32>
    tpu.vector_store %arg5[%c0_12, %c0_13, %c0_14], %22 {strides = array<i32>} : memref<1x4x128xf32, #tpu.memory_space<vmem>>, vector<1x4x128xf32>,
    return
  }
  func.func @transform_0(%arg0: i32, %arg1: i32) -> (i32, i32, i32) {
    %c0_i32 = arith.constant 0 : i32
    %c0_i32_0 = arith.constant 0 : i32
    return %arg0, %c0_i32, %arg1 : i32, i32, i32
  }
  func.func @transform_1(%arg0: i32, %arg1: i32) -> (i32, i32, i32) {
    %c0_i32 = arith.constant 0 : i32
    %c0_i32_0 = arith.constant 0 : i32
    %c0_i32_1 = arith.constant 0 : i32
    %c0_i32_2 = arith.constant 0 : i32
    return %c0_i32, %c0_i32_0, %c0_i32_1 : i32, i32, i32
  }
  func.func @transform_2(%arg0: i32, %arg1: i32) -> (i32, i32, i32) {
    %c0_i32 = arith.constant 0 : i32
    %c0_i32_0 = arith.constant 0 : i32
    %c0_i32_1 = arith.constant 0 : i32
    %c0_i32_2 = arith.constant 0 : i32
    return %c0_i32, %c0_i32_0, %c0_i32_1 : i32, i32, i32
  }
  func.func @transform_3(%arg0: i32, %arg1: i32) -> (i32, i32, i32) {
    %c0_i32 = arith.constant 0 : i32
    %c0_i32_0 = arith.constant 0 : i32
    return %arg0, %c0_i32, %arg1 : i32, i32, i32
  }
}

</mosaic_0001>

<bundles_post_ra>
// kernel: tpu_custom_call.1
= control target key start
LH: loop header
LB: loop body
LE: loop exit
PB: predicated region body
PF: predicated region fallthrough
CT: control target
= control target key end

     0   :  { %8 = vsyncpa [#allocation3], 0  ;;  %s756_s0 = inlined_call_operand.hbm [shape: f32[2,4,256], index: 0, kind: input, shape index: {}]   ;;  %s757_s1 = inlined_call_operand.vmem [shape: f32[1,4,1], index: 1, kind: input, shape index: {}]   ;;  %s758_s2 = inlined_call_operand.vmem [shape: f32[1,4,1], index: 2, kind: input, shape index: {}]   ;;  %s759_s3 = inlined_call_operand.hbm [shape: f32[2,4,256], index: 3, kind: output, shape index: {}]  }
   0x1   :  { %10 = vsyncpa [#allocation3 + $0x1], 0 }
   0x2   :  { %11 = vsyncpa [#allocation4], 0 }
   0x3   :  { %13 = vsyncpa [#allocation4 + $0x1], 0  ;;  %s590_s12 = smov 0   ;;  %s592_s13 = smov 0  }
   0x4   :  { %s594_s14 = smov 0   ;;  %s596_s15 = smov 0  }
   0x5   :  { %s598_s16 = smov 0   ;;  %s600_s17 = smov 0  }
   0x6   :  { %s602_s18 = smov 0   ;;  %s604_s19 = smov 0  }
   0x7 LB: > { %s344_s20 = sadd.s32 4294967295, %s565_s19   ;;  %s345_s21 = sadd.s32 4294967294, %s565_s19   ;;  %s565_s19 = sphi %s604_s19, %s19_s19   ;;  %s561_s18 = sphi %s602_s18, %s775_s18   ;;  %s557_s17 = sphi %s600_s17, %s774_s17   ;;  %s553_s16 = sphi %s598_s16, %s773_s16   ;;  %s549_s15 = sphi %s596_s15, %s772_s15   ;;  %s545_s14 = sphi %s594_s14, %s771_s14   ;;  %s541_s13 = sphi %s592_s13, %s770_s13   ;;  %s537_s12 = sphi %s590_s12, %s769_s12  }
   0x8   : > { %s28_s22 = sadd.s32 1, %s557_s17  ;;  %s31_s23 = sadd.s32 1, %s561_s18 }
   0x9   : > { %p29_p0 = scmp.ge.s32.totalorder %s28_s22, 2  ;;  %s40_s24 = sadd.s32 1, %s545_s14 }
   0xa   : > { %p47_p1 = scmp.ne.s32.totalorder %s545_s14, %s541_s13  ;;  %p48_p2 = scmp.eq.s32.totalorder %s565_s19, 0 }
   0xb   : > { %s777_s22 = smov (%p29_p0, %s28_s22), 0  ;;  %s779_s23 = smov (!%p29_p0, %s31_s23), %s561_s18 }
   0xc   : > { %s36_s25 = ssub.s32 %s557_s17, %s777_s22  ;;  %p643_p3 = por %p48_p2, %p47_p1 }
   0xd   : > { %p33_p4 = scmp.ge.s32.totalorder %s779_s23, 2  ;;  %p53_p5 = scmp.ne.s32.totalorder %s541_s13, %s537_s12 }
   0xe   : > { %p54_p6 = scmp.eq.s32.totalorder %s344_s20, 0  ;;  %p121_p7 = scmp.eq.s32.totalorder %s344_s20, 3 }
   0xf   : > { %s781_s23 = smov (%p33_p4, %s779_s23), 0  ;;  %p127_p10 = scmp.eq.s32.totalorder %s345_s21, 3 }
  0x10   : > { %762 = sst [smem:[#allocation8_spill]] %s781_s23  ;;  %p651_p8 = por %p54_p6, %p53_p5 }
  0x11   : > { %p655_p9 = por %p121_p7, %p47_p1  ;;  %s35_s29 = ssub.s32 %s561_s18, %s781_s23 }
  0x12   : > { %s37_s30 = sor.u32 %s36_s25, %s35_s29  ;;  %p661_p12 = por %p127_p10, %p53_p5 }
  0x13   : > { %p38_p11 = scmp.eq.s32.totalorder %s37_s30, 0  ;;  %p371_p13 = scmp.lt.s32.totalorder %s565_s19, 4 }
  0x14   : > { %s765_s4 = scalar_select %p661_p12, 1, 0 }
  0x15   : > { %s153_s5 = sand.u32 1, %s545_s14   ;;  %s349_s8 = sshll.u32 %s561_s18, 1 }
  0x16   : > { %s668_s6 = scalar_select %p38_p11, %s545_s14, %s40_s24  }
  0x17   : > { %s348_s7 = sshll.u32 %s153_s5, 2  ;;  %s162_s9 = sadd.s32 %s557_s17, %s349_s8 }
  0x18   : > { %s157_s10 = scalar_lea.vmem [#allocation2], %s348_s7  ;;  %s350_s20 = sshll.u32 %s162_s9, 6 }
  0x19   : > { %s166_s11 = sshll.u32 %s157_s10, 4  ;;  %s164_s25 = scalar_lea.hbm %s756_s0, %s350_s20  ;;  %s167_s11 = int_to_ptr.vmem [resolvable:$true] %s166_s11 }
  0x1a   : > { %p677_p0 = pnand %p371_p13, %p643_p3  ;;  %p351_p1 = scmp.ge.s32.totalorder %s565_s19, 1 }
  0x1b   : > { %p171_p2 = scmp.lt.s32.totalorder %s565_s19, 5  ;;  %s154_s24 = scalar_lea.sflag [#allocation3], %s153_s5 }
  0x1c   : > { %p443_p4 = pneg %p677_p0  ;;  %s454_s30 = scalar_lea.vmem %s167_s11, 64 }
  0x1d   : > { %p455_p5 = scmp.ne.s32.totalorder %s167_s11, %s454_s30  ;;  %s567_s7 = smov [#allocation2]  }
  0x1e   : > { %s459_s8 = sshll.u32 %s567_s7, 4  ;;  %s460_s8 = int_to_ptr.vmem [resolvable:$false] %s459_s8 }
  0x1f   : > { %p457_p6 = pnand %p455_p5, %p443_p4  ;;  %s461_s23 = scalar_lea.vmem %s460_s8, 128 }
  0x20   : > { %p462_p10 = scmp.lt.s32.totalorder %s167_s11, %s460_s8  ;;  %p463_p11 = scmp.lt.s32.totalorder %s461_s23, %s454_s30 }
  0x21   : > { %p458_p7 = pneg %p457_p6 }
  0x22   : > { %p464_p3 = por %p463_p11, %p462_p10 }
  0x24   : > { %p465_p13 = pnand %p464_p3, %p458_p7 }
  0x26   : > { %468 = shalt.err (!%p465_p13)
}
  0x27   : > { %366 = dma.hbm_to_vmem [thread:$0]  (!%p677_p0), %s164_s25, 64, %s167_s11, %s154_s24  }
  0x28   : > { %p172_p12 = pnand %p351_p1, %p171_p2 }
  0x29   : > { %s692_s26 = sand.u32 (!%p172_p12), 1, %s541_s13  }
  0x2a   : > { %175 = sbr.rel (%p172_p12) target bundleno = 193 (0xc1), region = 32  ;;  %s352_s5 = sshll.u32 (!%p172_p12), %s692_s26, 2 }
  0x2b   : > { %s178_s9 = scalar_lea.sflag (!%p172_p12), [#allocation3], %s692_s26  ;;  %s181_s10 = scalar_lea.vmem (!%p172_p12), [#allocation2], %s352_s5 }
  0x2f   : > { %528 = dma.done.wait (%p651_p8), %s178_s9, 64  }
  0x30   : > { %530 = vsyncadd (%p651_p8), %s178_s9, 4294967232  ;;  %v568_v0 = vmov 0   ;;  %v227_v1 = vld [vmem:[%s757_s1] sm:$0xf]  ;;  %vm205_vm0 = vcmask 1043456   ;;  %s355_s27 = sshll.u32 %s553_s16, 1 }
  0x31   : > { %438 = vset.pattern.permute.xlu0 %v568_v0  ;;  %v235_v2 = vld [vmem:[%s758_s2] sm:$0xf]  ;;  %s255_s29 = sadd.s32 %s549_s15, %s355_s27  ;;  %s203_s30 = scalar_lea.vmem [#allocation5], %s352_s5 }
  0x32   : > { %230 = vperm.xlu0 %438, %v227_v1   ;;  %v204_v3 = vld [vmem:[%s181_s10] sm:$0xf]  ;;  %s356_s24 = sshll.u32 %s255_s29, 6  ;;  %s259_s7 = sshll.u32 %s203_s30, 4  ;;  %s260_s7 = int_to_ptr.vmem [resolvable:$true] %s259_s7 }
  0x33   : > { %v206_v4 = vsel %vm205_vm0, %v204_v3, 0.0  ;;  %s257_s9 = scalar_lea.hbm %s759_s3, %s356_s24  ;;  %s244_s10 = scalar_lea.sflag [#allocation4], %s692_s26 }
  0x34   : > { %v207_v5 = vrot.slane %v206_v4, 4  ;;  %s469_s16 = scalar_lea.vmem %s260_s7, 64  ;;  %s569_s15 = smov [#allocation5]  }
  0x35   : > { %p470_p8 = scmp.ne.s32.totalorder %s260_s7, %s469_s16  ;;  %s473_s11 = sshll.u32 %s569_s15, 4  ;;  %s474_s11 = int_to_ptr.vmem [resolvable:$false] %s473_s11 }
  0x36   : > { %238 = vperm.xlu0 %438, %v235_v2   ;;  %v208_v6 = vadd.f32 %v207_v5, %v206_v4  ;;  %s475_s5 = scalar_lea.vmem %s474_s11, 128  ;;  %p476_p1 = scmp.lt.s32.totalorder %s260_s7, %s474_s11 }
  0x37   : > { %p471_p12 = pnand %p470_p8, %p655_p9  ;;  %p477_p2 = scmp.lt.s32.totalorder %s475_s5, %s469_s16 }
  0x38   : > { %v209_v7 = vrot.slane %v208_v6, 2 }
  0x39   : > { %p472_p0 = pneg %p471_p12  ;;  %p478_p4 = por %p477_p2, %p476_p1 }
  0x3a   : > { %v210_v8 = vadd.f32 %v209_v7, %v208_v6 }
  0x3b   : > { %p479_p5 = pnand %p478_p4, %p472_p0 }
  0x3c   : > { %v211_v9 = vrot.slane %v210_v8, 1 }
  0x3e   : > { %v212_v10 = vadd.f32 %v211_v9, %v210_v8 }
  0x40   : > { %v214_v11 = vmul.f32 0.25, %v212_v10 }
  0x42   : > { %v215_v12 = vsub.f32 %v204_v3, %v214_v11 }
  0x44   : > { %v216_v13 = vmul.f32 %v215_v12, %v215_v12 }
  0x46   : > { %v217_v14 = vsel %vm205_vm0, %v216_v13, 0.0 }
  0x47   : > { %v218_v15 = vrot.slane %v217_v14, 4 }
  0x49   : > { %v219_v16 = vadd.f32 %v218_v15, %v217_v14 }
  0x4b   : > { %v220_v17 = vrot.slane %v219_v16, 2 }
  0x4d   : > { %v221_v18 = vadd.f32 %v220_v17, %v219_v16 }
  0x4f   : > { %v222_v19 = vrot.slane %v221_v18, 1 }
  0x51   : > { %v223_v20 = vadd.f32 %v222_v19, %v221_v18 }
  0x53   : > { %v224_v21 = vmul.f32 0.25, %v223_v20 }
  0x55   : > { %v225_v22 = vadd.f32 1e-06, %v224_v21 }
  0x57   : > { %439 = vrsqrt.f32 %v225_v22 }
  0x64   : > { %v440_v23 = vpop.eup %439 }
  0xad   : > { %v231_v24 = vpop.permute.xlu0 %230 }
  0xae   : > { %v233_v25 = vmul.f32 %v440_v23, %v231_v24 }
  0xb0   : > { %v234_v26 = vmul.f32 %v233_v25, %v215_v12 }
  0xb1   : > { %v239_v27 = vpop.permute.xlu0 %238 }
  0xb2   : > { %v241_v28 = vadd.f32 %v239_v27, %v234_v26 }
  0xb4   : > { %242 = vst [vmem:[%s203_s30] sm:$0xf] %v241_v28 }
  0xb5   : > { %482 = shalt.err (!%p479_p5)
}
  0xb6   : > { %s483_s20 = scalar_lea.hbm %s257_s9, 64  ;;  %s487_s25 = scalar_lea.hbm %s759_s3, 256 }
  0xb7   : > { %p484_p6 = scmp.ne.s32.totalorder %s257_s9, %s483_s20  ;;  %p488_p11 = scmp.lt.s32.totalorder %s257_s9, %s759_s3 }
  0xb8   : > { %p489_p3 = scmp.lt.s32.totalorder %s487_s25, %s483_s20 }
  0xb9   : > { %p485_p7 = pnand %p484_p6, %p655_p9 }
  0xba   : > { %p490_p13 = por %p489_p3, %p488_p11 }
  0xbb   : > { %p486_p10 = pneg %p485_p7 }
  0xbd   : > { %p491_p8 = pnand %p490_p13, %p486_p10 }
  0xbf   : > { %494 = shalt.err (!%p491_p8)
}
  0xc0   : > { %361 = dma.vmem_to_hbm [thread:$0]  (%p655_p9), %s260_s7, 64, %s257_s9, %s244_s10  }
  0xc1 PF: > { %p372_p12 = scmp.ge.s32.totalorder %s565_s19, 2  ;;  %s271_s24 = sand.u32 1, %s537_s12  }
  0xc2   : > { %p767_p0 = scmp.ne.s32.totalorder %s765_s4, 0  ;;  %s272_s30 = scalar_lea.sflag [#allocation4], %s271_s24 }
  0xc4   : > { %p368_p1 = pnand %p372_p12, %p767_p0 }
  0xc6   : > { %p369_p2 = pneg %p368_p1 }
  0xc8   : > { %532 = dma.done.wait (%p369_p2), %s272_s30, 64  }
  0xc9   : > { %534 = vsyncadd (%p369_p2), %s272_s30, 4294967232  ;;  %s19_s19 = sadd.s32 1, %s565_s19   ;;  %s768_s28 = sld [smem:[#allocation8_spill]] }
  0xca   : > { %p16_p4 = scmp.ge.s32.totalorder %s19_s19, 6   ;;  %s769_s12 = smov %s541_s13 }
  0xcb   : > { %s770_s13 = smov %s545_s14  ;;  %s771_s14 = smov %s668_s6 }
  0xcc   : > { %s772_s15 = smov %s557_s17  ;;  %s773_s16 = smov %s561_s18 }
  0xcd   : > { %s774_s17 = smov %s777_s22  ;;  %18 = sbr.rel (!%p16_p4) target bundleno = 7 (0x7), region = 77 }
  0xcf   : > { %s775_s18 = smov %s768_s28 }
  0xd2   :  { %277 = vsyncpa [#allocation3], 1 }
  0xd3   :  { %279 = vsyncpa [#allocation3 + $0x1], 1 }
  0xd4   :  { %280 = vsyncpa [#allocation4], 1 }
  0xd5   :  { %282 = vsyncpa [#allocation4 + $0x1], 1 }

</bundles_post_ra>
